<compile_context>
chip_gen: v7x
topology: tpu7x:2x2x1
jax: 0.10.0
libtpu: 0.0.40
codegen_flags: <defaults>
</compile_context>

<pallas_src>
import functools

import jax
import jax.numpy as jnp
from jax import lax
from jax.experimental import pallas as pl
from jax.experimental.pallas import tpu as pltpu

_NEG_BIG = -1e30  # finite stand-in for -inf (keeps exp()/max() NaN-free)


def _round_up(x, m):
    return (x + m - 1) // m * m


def _affinity2d_kernel(zaug_ref, wcombo_ref, be_ref, wb_ref, bb_ref,
                       o_ref, m_s, l_s, acc_s, *, L, c_z):
    k = pl.program_id(1)

    @pl.when(k == 0)
    def _():
        m_s[...] = jnp.full_like(m_s, _NEG_BIG)
        l_s[...] = jnp.zeros_like(l_s)
        acc_s[...] = jnp.zeros_like(acc_s)

    zaug = zaug_ref[0]                                  # [tl, c_z+2] (stream dtype)
    tl = zaug.shape[0]

    # Row validity = (row index < L) AND (inter_pair_mask lane > 0.5).
    row_ids = k * tl + lax.broadcasted_iota(jnp.int32, (tl, 1), 0)
    in_range = row_ids < L
    mk = zaug[:, c_z + 1:c_z + 2]
    valid = jnp.logical_and(in_range, mk > 0.5)         # [tl, 1] bool
    valid_f = valid.astype(jnp.float32)

    # Zero invalid rows *before* the matmul so OOB garbage (possible NaN/Inf in
    # the partial tail block) never reaches the online-softmax statistics.
    z_m = jnp.where(valid, zaug, jnp.zeros_like(zaug))

    # Single fused MXU pass -> [x | w_logit].  b_w is dropped (softmax is
    # shift-invariant); b_e is added once at finalize.
    xw = jnp.dot(z_m, wcombo_ref[...], preferred_element_type=jnp.float32)
    x = xw[:, :c_z]                                     # [tl, c_z] f32
    w = xw[:, c_z:c_z + 1]                              # [tl, 1]   f32
    w = jnp.where(valid, w, _NEG_BIG)                   # masked_fill(~mask, -inf)

    # Online softmax-weighted pooling over the flattened pair axis.
    m_prev = m_s[...]                                   # [1, 1]
    m_new = jnp.maximum(m_prev, jnp.max(w, axis=0, keepdims=True))
    alpha = jnp.exp(m_prev - m_new)
    p = jnp.exp(w - m_new) * valid_f                    # invalid rows -> exactly 0
    l_s[...] = alpha * l_s[...] + jnp.sum(p, axis=0, keepdims=True)
    acc_s[...] = alpha * acc_s[...] + jnp.sum(p * x, axis=0, keepdims=True)
    m_s[...] = m_new

    @pl.when(k == pl.num_programs(1) - 1)
    def _():
        l = l_s[...]
        inv = jnp.where(l > 0.0, 1.0 / l, 0.0)          # all-masked -> 0 (nan_to_num)
        gate = jnp.where(l > 0.0, 1.0, 0.0)
        pooled = acc_s[...] * inv + be_ref[...].astype(jnp.float32) * gate
        out = jnp.dot(pooled, wb_ref[...].astype(jnp.float32),
                      preferred_element_type=jnp.float32)
        out = out + bb_ref[...].astype(jnp.float32)
        o_ref[0] = out.astype(o_ref.dtype)


@functools.partial(jax.jit, static_argnames=("tile_l", "stream_dtype"))
def affinity_2d_predictor(z, inter_contacts_logits, inter_pair_mask, params,
                          tile_l=4096, stream_dtype=jnp.bfloat16):
    """z: [B,N,M,c_z], logits: [B,N,M,1], mask: [B,N,M] (or [B,N,M,1]) -> [B, num_bins]."""
    B, N, M, c_z = z.shape
    num_bins = params["wb"].shape[1]
    L = N * M

    # One packed activation stream: [z | inter_contact_logit | pair_mask].
    z_aug = jnp.concatenate(
        [z.reshape(B, L, c_z),
         inter_contacts_logits.reshape(B, L, 1).astype(z.dtype),
         inter_pair_mask.reshape(B, L, 1).astype(z.dtype)],
        axis=-1).astype(stream_dtype)                              # [B, L, c_z+2]

    # Fused projection weight: columns [W_e | W_w[:c_z]]; logit row carries
    # w_last; the mask row is zero (mask lane contributes nothing to x or w).
    w_combo = jnp.zeros((c_z + 2, c_z + 1), jnp.float32)
    w_combo = w_combo.at[:c_z, :c_z].set(params["we"].astype(jnp.float32))
    w_combo = w_combo.at[:c_z, c_z:].set(params["wz"].astype(jnp.float32))
    w_combo = w_combo.at[c_z:c_z + 1, c_z:].set(params["wlast"].astype(jnp.float32))
    w_combo = w_combo.astype(stream_dtype)

    # Row tile: multiple of 8 sublanes, never larger than the pair axis allows
    # (no jnp.pad; the tail partial block is masked in-kernel).
    if L >= 8:
        tl = min(_round_up(max(tile_l, 8), 8), (L // 8) * 8)
    else:
        tl = L                                       # single block == full dim
    grid = (B, pl.cdiv(L, tl))

    # VMEM budget from block math (z_aug tile lane-pads to 128) + headroom.
    item = jnp.dtype(stream_dtype).itemsize
    vmem_need = (2 * tl * _round_up(c_z + 2, 128) * item            # z_aug x2 buf
                 + 2 * _round_up(c_z + 2, 8) * _round_up(c_z + 1, 128) * item
                 + 6 * 8 * _round_up(max(c_z, num_bins), 128) * 4   # be/wb/bb/out
                 + (2 * 8 * 128 + 8 * _round_up(c_z, 128)) * 4)     # scratch
    vmem_limit = int(min(max(2 * vmem_need + (8 << 20), 32 << 20), 64 << 20))

    cost = pl.CostEstimate(
        flops=2 * B * L * (c_z + 2) * (c_z + 1) + 2 * B * c_z * num_bins,
        transcendentals=B * L,
        bytes_accessed=B * L * (c_z + 2) * item
        + (c_z + 2) * (c_z + 1) * item
        + (c_z + 2) * num_bins * 4 + c_z * 4 + B * num_bins * 4)

    out = pl.pallas_call(
        functools.partial(_affinity2d_kernel, L=L, c_z=c_z),
        out_shape=jax.ShapeDtypeStruct((B, 1, num_bins), z.dtype),
        grid=grid,
        in_specs=[
            pl.BlockSpec((1, tl, c_z + 2), lambda b, k: (b, k, 0)),   # packed stream
            pl.BlockSpec((c_z + 2, c_z + 1), lambda b, k: (0, 0)),    # fused weight
            pl.BlockSpec((1, c_z), lambda b, k: (0, 0)),              # b_embed
            pl.BlockSpec((c_z, num_bins), lambda b, k: (0, 0)),       # W_bins
            pl.BlockSpec((1, num_bins), lambda b, k: (0, 0)),         # b_bins
        ],
        out_specs=pl.BlockSpec((1, 1, num_bins), lambda b, k: (b, 0, 0)),
        scratch_shapes=[
            pltpu.VMEM((1, 1), jnp.float32),      # running max m
            pltpu.VMEM((1, 1), jnp.float32),      # running denom l
            pltpu.VMEM((1, c_z), jnp.float32),    # running weighted sum
        ],
        compiler_params=pltpu.CompilerParams(
            dimension_semantics=("parallel", "arbitrary"),
            vmem_limit_bytes=vmem_limit),
        cost_estimate=cost,
    )(z_aug, w_combo, params["be"], params["wb"], params["bb"])

    return out.reshape(B, num_bins)


def init_params(key, c_z, num_bins, dtype=jnp.float32):
    """Synthetic params. Linear weights stored as [in, out] (torch W^T)."""
    ks = jax.random.split(key, 6)

    def lin(k, fan_in, fan_out):
        return (jax.random.normal(k, (fan_in, fan_out)) / jnp.sqrt(fan_in)).astype(dtype)

    w_full = lin(ks[0], c_z + 1, 1)           # weight_linear: (c_z+1) -> 1
    wz = w_full[:c_z, :]                      # [c_z, 1]
    wlast = w_full[c_z:, :]                   # [1, 1] (inter-contact column)
    bw = (0.1 * jax.random.normal(ks[1], (1, 1))).astype(dtype)
    we = lin(ks[2], c_z, c_z)                 # embed_linear
    be = (0.1 * jax.random.normal(ks[3], (1, c_z))).astype(dtype)
    wb = lin(ks[4], c_z, num_bins)            # bins_linear
    bb = (0.1 * jax.random.normal(ks[5], (1, num_bins))).astype(dtype)
    return dict(wz=wz, wlast=wlast, bw=bw, we=we, be=be, wb=wb, bb=bb)


def _reference(z, inter_contacts_logits, inter_pair_mask, p):
    """Pure-JAX mirror of the PyTorch forward (f32)."""
    B, N, M, c_z = z.shape
    L = N * M
    zc = jnp.concatenate([z, inter_contacts_logits], axis=-1).astype(jnp.float32)
    w_full = jnp.concatenate([p["wz"], p["wlast"]], axis=0).astype(jnp.float32)
    weights = zc @ w_full + p["bw"]                                    # [B,N,M,1]
    x = z.astype(jnp.float32) @ p["we"].astype(jnp.float32) + p["be"]  # [B,N,M,c_z]

    fw = weights.reshape(B, L, 1)
    fx = x.reshape(B, L, c_z)
    fm = inter_pair_mask.reshape(B, L, 1)
    fw = jnp.where(fm, fw, -jnp.inf)
    fw = jax.nn.softmax(fw, axis=1)
    fw = jnp.nan_to_num(fw, nan=0.0)
    pooled = jnp.sum(fw * fx, axis=1)                                  # [B, c_z]
    return (pooled @ p["wb"].astype(jnp.float32) + p["bb"]).astype(z.dtype)


if __name__ == "__main__":
    B, N, M = 2, 9, 14            # L = 126 (not a multiple of 8 -> tail-mask path)
    c_z, num_bins = 32, 16

    key = jax.random.PRNGKey(0)
    kz, kl, km, kp = jax.random.split(key, 4)
    z = jax.random.normal(kz, (B, N, M, c_z), jnp.float32)
    logits = jax.random.normal(kl, (B, N, M, 1), jnp.float32)
    mask = jax.random.uniform(km, (B, N, M)) > 0.3
    mask = mask.at[1].set(False)  # batch 1 fully masked -> exercises nan_to_num path
    params = init_params(kp, c_z, num_bins)

    ref = _reference(z, logits, mask, params)

    # Exact path, small tile -> multi-step online softmax + tail masking.
    out_f32_small = jax.block_until_ready(
        affinity_2d_predictor(z, logits, mask, params, tile_l=64,
                              stream_dtype=jnp.float32))
    # Exact path, default (single large) tile.
    out_f32_big = jax.block_until_ready(
        affinity_2d_predictor(z, logits, mask, params, stream_dtype=jnp.float32))
    # Default production path: bf16 streaming.
    out_bf16 = jax.block_until_ready(
        affinity_2d_predictor(z, logits, mask, params))

    assert out_f32_small.shape == (B, num_bins), out_f32_small.shape
    assert jnp.allclose(out_f32_small, ref, atol=1e-4, rtol=1e-4), \
        float(jnp.max(jnp.abs(out_f32_small - ref)))
    assert jnp.allclose(out_f32_big, ref, atol=1e-4, rtol=1e-4), \
        float(jnp.max(jnp.abs(out_f32_big - ref)))
    assert jnp.allclose(out_bf16, ref, atol=1e-1, rtol=1e-1), \
        float(jnp.max(jnp.abs(out_bf16 - ref)))

    print("KERNEL_OK")
</pallas_src>

<mosaic_0001>
module attributes {stable_mosaic.version = 11 : i64} {
  func.func @_affinity2d_kernel(%arg0: i32, %arg1: i32, %arg2: memref<1x64x34xf32, #tpu.memory_space<vmem>>, %arg3: memref<34x33xf32, #tpu.memory_space<vmem>>, %arg4: memref<1x32xf32, #tpu.memory_space<vmem>>, %arg5: memref<32x16xf32, #tpu.memory_space<vmem>>, %arg6: memref<1x16xf32, #tpu.memory_space<vmem>>, %arg7: memref<1x1x16xf32, #tpu.memory_space<vmem>>, %arg8: memref<1x1xf32, #tpu.memory_space<vmem>>, %arg9: memref<1x1xf32, #tpu.memory_space<vmem>>, %arg10: memref<1x32xf32, #tpu.memory_space<vmem>>) attributes {dimension_semantics = [#tpu.dimension_semantics<parallel>, #tpu.dimension_semantics<arbitrary>], iteration_bounds = array<i64: 2, 2>, scalar_prefetch = 0 : i64, scratch_operands = 3 : i64, tpu.core_type = #tpu.core_type<tc>, window_params = [{transform_indices = @transform_0, window_bounds = array<i64: 1, 64, 34>}, {pipeline_mode = #tpu.pipeline_mode<synchronous>, transform_indices = @transform_1, window_bounds = array<i64: 34, 33>}, {pipeline_mode = #tpu.pipeline_mode<synchronous>, transform_indices = @transform_2, window_bounds = array<i64: 1, 32>}, {pipeline_mode = #tpu.pipeline_mode<synchronous>, transform_indices = @transform_3, window_bounds = array<i64: 32, 16>}, {pipeline_mode = #tpu.pipeline_mode<synchronous>, transform_indices = @transform_4, window_bounds = array<i64: 1, 16>}, {transform_indices = @transform_5, window_bounds = array<i64: 1, 1, 16>}]} {
    %c0_i32 = arith.constant 0 : i32
    %0 = arith.cmpi eq, %arg1, %c0_i32 : i32
    %1 = arith.extui %0 : i1 to i32
    %c0_i32_0 = arith.constant 0 : i32
    %2 = arith.cmpi ne, %1, %c0_i32_0 : i32
    scf.if %2 {
      %cst_24 = arith.constant -1.000000e+30 : f32
      %56 = vector.broadcast %cst_24 : f32 to vector<1x1xf32>
      %c0_25 = arith.constant 0 : index
      %c0_26 = arith.constant 0 : index
      %57 = vector.load %arg8[%c0_25, %c0_26] : memref<1x1xf32, #tpu.memory_space<vmem>>, vector<1x1xf32>
      tpu.vector_store %arg8[%c0_25, %c0_26], %56 {strides = array<i32>} : memref<1x1xf32, #tpu.memory_space<vmem>>, vector<1x1xf32>,
      %cst_27 = arith.constant 0.000000e+00 : f32
      %58 = vector.broadcast %cst_27 : f32 to vector<1x1xf32>
      %c0_28 = arith.constant 0 : index
      %c0_29 = arith.constant 0 : index
      %59 = vector.load %arg9[%c0_28, %c0_29] : memref<1x1xf32, #tpu.memory_space<vmem>>, vector<1x1xf32>
      tpu.vector_store %arg9[%c0_28, %c0_29], %58 {strides = array<i32>} : memref<1x1xf32, #tpu.memory_space<vmem>>, vector<1x1xf32>,
      %cst_30 = arith.constant 0.000000e+00 : f32
      %60 = vector.broadcast %cst_30 : f32 to vector<1x32xf32>
      %c0_31 = arith.constant 0 : index
      %c0_32 = arith.constant 0 : index
      %61 = vector.load %arg10[%c0_31, %c0_32] : memref<1x32xf32, #tpu.memory_space<vmem>>, vector<1x32xf32>
      tpu.vector_store %arg10[%c0_31, %c0_32], %60 {strides = array<i32>} : memref<1x32xf32, #tpu.memory_space<vmem>>, vector<1x32xf32>,
    } else {
    }
    %c0 = arith.constant 0 : index
    %c0_1 = arith.constant 0 : index
    %c0_2 = arith.constant 0 : index
    %3 = vector.load %arg2[%c0, %c0_1, %c0_2] : memref<1x64x34xf32, #tpu.memory_space<vmem>>, vector<1x64x34xf32>
    %4 = vector.shape_cast %3 : vector<1x64x34xf32> to vector<64x34xf32>
    %c64_i32 = arith.constant 64 : i32
    %5 = arith.muli %arg1, %c64_i32 : i32
    %6 = tpu.iota {dimensions = array<i32: 0>} : vector<64x1xi32>
    %7 = vector.broadcast %5 : i32 to vector<64x1xi32>
    %8 = arith.addi %7, %6 : vector<64x1xi32>
    %c126_i32 = arith.constant 126 : i32
    %9 = vector.broadcast %c126_i32 : i32 to vector<64x1xi32>
    %10 = arith.cmpi slt, %8, %9 : vector<64x1xi32>
    %11 = vector.extract_strided_slice %4 {offsets = [0, 33], sizes = [64, 1], strides = [1, 1]} : vector<64x34xf32> to vector<64x1xf32>
    %cst = arith.constant 5.000000e-01 : f32
    %12 = vector.broadcast %cst : f32 to vector<64x1xf32>
    %13 = arith.cmpf ogt, %11, %12 : vector<64x1xf32>
    %14 = arith.andi %10, %13 : vector<64x1xi1>
    %15 = arith.extui %14 : vector<64x1xi1> to vector<64x1xi32>
    %16 = arith.sitofp %15 : vector<64x1xi32> to vector<64x1xf32>
    %cst_3 = arith.constant 0.000000e+00 : f32
    %17 = vector.broadcast %cst_3 : f32 to vector<64x34xf32>
    %18 = vector.shape_cast %14 : vector<64x1xi1> to vector<64x1xi1>
    %19 = vector.broadcast %18 : vector<64x1xi1> to vector<64x34xi1>
    %20 = arith.select %19, %4, %17 : vector<64x34xi1>, vector<64x34xf32>
    %c0_4 = arith.constant 0 : index
    %c0_5 = arith.constant 0 : index
    %21 = vector.load %arg3[%c0_4, %c0_5] : memref<34x33xf32, #tpu.memory_space<vmem>>, vector<34x33xf32>
    %cst_6 = arith.constant dense<0.000000e+00> : vector<64x33xf32>
    %22 = tpu.matmul %20, %21, %cst_6 {dimension_numbers = #tpu.dot_dimension_numbers<[1], [0], [0], [1], [0, 0, 1, 1], [], []>} : vector<64x34xf32>, vector<34x33xf32>, vector<64x33xf32> -> vector<64x33xf32>
    %23 = vector.extract_strided_slice %22 {offsets = [0, 0], sizes = [64, 32], strides = [1, 1]} : vector<64x33xf32> to vector<64x32xf32>
    %24 = vector.extract_strided_slice %22 {offsets = [0, 32], sizes = [64, 1], strides = [1, 1]} : vector<64x33xf32> to vector<64x1xf32>
    %cst_7 = arith.constant -1.000000e+30 : f32
    %25 = vector.broadcast %cst_7 : f32 to vector<64x1xf32>
    %26 = arith.select %14, %24, %25 : vector<64x1xi1>, vector<64x1xf32>
    %c0_8 = arith.constant 0 : index
    %c0_9 = arith.constant 0 : index
    %27 = vector.load %arg8[%c0_8, %c0_9] : memref<1x1xf32, #tpu.memory_space<vmem>>, vector<1x1xf32>
    %cst_10 = arith.constant dense<0xFF800000> : vector<1xf32>
    %28 = vector.multi_reduction <maximumf>, %26, %cst_10 [0] : vector<64x1xf32> to vector<1xf32>
    %29 = vector.shape_cast %28 : vector<1xf32> to vector<1x1xf32>
    %30 = arith.maximumf %27, %29 : vector<1x1xf32>
    %31 = arith.subf %27, %30 : vector<1x1xf32>
    %32 = math.exp %31 : vector<1x1xf32>
    %33 = vector.broadcast %30 : vector<1x1xf32> to vector<64x1xf32>
    %34 = arith.subf %26, %33 : vector<64x1xf32>
    %35 = math.exp %34 : vector<64x1xf32>
    %36 = arith.mulf %35, %16 : vector<64x1xf32>
    %c0_11 = arith.constant 0 : index
    %c0_12 = arith.constant 0 : index
    %37 = vector.load %arg9[%c0_11, %c0_12] : memref<1x1xf32, #tpu.memory_space<vmem>>, vector<1x1xf32>
    %38 = arith.mulf %32, %37 : vector<1x1xf32>
    %cst_13 = arith.constant dense<0.000000e+00> : vector<1xf32>
    %39 = vector.multi_reduction <add>, %36, %cst_13 [0] : vector<64x1xf32> to vector<1xf32>
    %40 = vector.shape_cast %39 : vector<1xf32> to vector<1x1xf32>
    %41 = arith.addf %38, %40 : vector<1x1xf32>
    %c0_14 = arith.constant 0 : index
    %c0_15 = arith.constant 0 : index
    %42 = vector.load %arg9[%c0_14, %c0_15] : memref<1x1xf32, #tpu.memory_space<vmem>>, vector<1x1xf32>
    tpu.vector_store %arg9[%c0_14, %c0_15], %41 {strides = array<i32>} : memref<1x1xf32, #tpu.memory_space<vmem>>, vector<1x1xf32>,
    %c0_16 = arith.constant 0 : index
    %c0_17 = arith.constant 0 : index
    %43 = vector.load %arg10[%c0_16, %c0_17] : memref<1x32xf32, #tpu.memory_space<vmem>>, vector<1x32xf32>
    %44 = vector.broadcast %32 : vector<1x1xf32> to vector<1x32xf32>
    %45 = arith.mulf %44, %43 : vector<1x32xf32>
    %46 = vector.broadcast %36 : vector<64x1xf32> to vector<64x32xf32>
    %47 = arith.mulf %46, %23 : vector<64x32xf32>
    %cst_18 = arith.constant dense<0.000000e+00> : vector<32xf32>
    %48 = vector.multi_reduction <add>, %47, %cst_18 [0] : vector<64x32xf32> to vector<32xf32>
    %49 = vector.shape_cast %48 : vector<32xf32> to vector<1x32xf32>
    %50 = arith.addf %45, %49 : vector<1x32xf32>
    %c0_19 = arith.constant 0 : index
    %c0_20 = arith.constant 0 : index
    %51 = vector.load %arg10[%c0_19, %c0_20] : memref<1x32xf32, #tpu.memory_space<vmem>>, vector<1x32xf32>
    tpu.vector_store %arg10[%c0_19, %c0_20], %50 {strides = array<i32>} : memref<1x32xf32, #tpu.memory_space<vmem>>, vector<1x32xf32>,
    %c0_21 = arith.constant 0 : index
    %c0_22 = arith.constant 0 : index
    %52 = vector.load %arg8[%c0_21, %c0_22] : memref<1x1xf32, #tpu.memory_space<vmem>>, vector<1x1xf32>
    tpu.vector_store %arg8[%c0_21, %c0_22], %30 {strides = array<i32>} : memref<1x1xf32, #tpu.memory_space<vmem>>, vector<1x1xf32>,
    %c1_i32 = arith.constant 1 : i32
    %53 = arith.cmpi eq, %arg1, %c1_i32 : i32
    %54 = arith.extui %53 : i1 to i32
    %c0_i32_23 = arith.constant 0 : i32
    %55 = arith.cmpi ne, %54, %c0_i32_23 : i32
    scf.if %55 {
      %c0_24 = arith.constant 0 : index
      %c0_25 = arith.constant 0 : index
      %56 = vector.load %arg9[%c0_24, %c0_25] : memref<1x1xf32, #tpu.memory_space<vmem>>, vector<1x1xf32>
      %cst_26 = arith.constant 0.000000e+00 : f32
      %57 = vector.broadcast %cst_26 : f32 to vector<1x1xf32>
      %58 = arith.cmpf ogt, %56, %57 : vector<1x1xf32>
      %cst_27 = arith.constant 1.000000e+00 : f32
      %59 = vector.broadcast %cst_27 : f32 to vector<1x1xf32>
      %60 = arith.divf %59, %56 : vector<1x1xf32>
      %cst_28 = arith.constant 0.000000e+00 : f32
      %61 = vector.broadcast %cst_28 : f32 to vector<1x1xf32>
      %62 = arith.select %58, %60, %61 : vector<1x1xi1>, vector<1x1xf32>
      %cst_29 = arith.constant 0.000000e+00 : f32
      %63 = vector.broadcast %cst_29 : f32 to vector<1x1xf32>
      %64 = arith.cmpf ogt, %56, %63 : vector<1x1xf32>
      %cst_30 = arith.constant 1.000000e+00 : f32
      %cst_31 = arith.constant 0.000000e+00 : f32
      %65 = vector.broadcast %cst_30 : f32 to vector<1x1xf32>
      %66 = vector.broadcast %cst_31 : f32 to vector<1x1xf32>
      %67 = arith.select %64, %65, %66 : vector<1x1xi1>, vector<1x1xf32>
      %c0_32 = arith.constant 0 : index
      %c0_33 = arith.constant 0 : index
      %68 = vector.load %arg10[%c0_32, %c0_33] : memref<1x32xf32, #tpu.memory_space<vmem>>, vector<1x32xf32>
      %69 = vector.broadcast %62 : vector<1x1xf32> to vector<1x32xf32>
      %70 = arith.mulf %68, %69 : vector<1x32xf32>
      %c0_34 = arith.constant 0 : index
      %c0_35 = arith.constant 0 : index
      %71 = vector.load %arg4[%c0_34, %c0_35] : memref<1x32xf32, #tpu.memory_space<vmem>>, vector<1x32xf32>
      %72 = vector.broadcast %67 : vector<1x1xf32> to vector<1x32xf32>
      %73 = arith.mulf %71, %72 : vector<1x32xf32>
      %74 = arith.addf %70, %73 : vector<1x32xf32>
      %c0_36 = arith.constant 0 : index
      %c0_37 = arith.constant 0 : index
      %75 = vector.load %arg5[%c0_36, %c0_37] : memref<32x16xf32, #tpu.memory_space<vmem>>, vector<32x16xf32>
      %cst_38 = arith.constant dense<0.000000e+00> : vector<1x16xf32>
      %76 = tpu.matmul %74, %75, %cst_38 {dimension_numbers = #tpu.dot_dimension_numbers<[1], [0], [0], [1], [0, 0, 1, 1], [], []>} : vector<1x32xf32>, vector<32x16xf32>, vector<1x16xf32> -> vector<1x16xf32>
      %c0_39 = arith.constant 0 : index
      %c0_40 = arith.constant 0 : index
      %77 = vector.load %arg6[%c0_39, %c0_40] : memref<1x16xf32, #tpu.memory_space<vmem>>, vector<1x16xf32>
      %78 = arith.addf %76, %77 : vector<1x16xf32>
      %c0_41 = arith.constant 0 : index
      %c0_42 = arith.constant 0 : index
      %c0_43 = arith.constant 0 : index
      %79 = vector.load %arg7[%c0_41, %c0_42, %c0_43] : memref<1x1x16xf32, #tpu.memory_space<vmem>>, vector<1x1x16xf32>
      %80 = vector.shape_cast %79 : vector<1x1x16xf32> to vector<1x16xf32>
      %81 = vector.shape_cast %78 : vector<1x16xf32> to vector<1x1x16xf32>
      tpu.vector_store %arg7[%c0_41, %c0_42, %c0_43], %81 {strides = array<i32>} : memref<1x1x16xf32, #tpu.memory_space<vmem>>, vector<1x1x16xf32>,
    } else {
    }
    return
  }
  func.func @transform_0(%arg0: i32, %arg1: i32) -> (i32, i32, i32) {
    %c0_i32 = arith.constant 0 : i32
    %c0_i32_0 = arith.constant 0 : i32
    return %arg0, %arg1, %c0_i32 : i32, i32, i32
  }
  func.func @transform_1(%arg0: i32, %arg1: i32) -> (i32, i32) {
    %c0_i32 = arith.constant 0 : i32
    %c0_i32_0 = arith.constant 0 : i32
    %c0_i32_1 = arith.constant 0 : i32
    return %c0_i32, %c0_i32_0 : i32, i32
  }
  func.func @transform_2(%arg0: i32, %arg1: i32) -> (i32, i32) {
    %c0_i32 = arith.constant 0 : i32
    %c0_i32_0 = arith.constant 0 : i32
    %c0_i32_1 = arith.constant 0 : i32
    return %c0_i32, %c0_i32_0 : i32, i32
  }
  func.func @transform_3(%arg0: i32, %arg1: i32) -> (i32, i32) {
    %c0_i32 = arith.constant 0 : i32
    %c0_i32_0 = arith.constant 0 : i32
    %c0_i32_1 = arith.constant 0 : i32
    return %c0_i32, %c0_i32_0 : i32, i32
  }
  func.func @transform_4(%arg0: i32, %arg1: i32) -> (i32, i32) {
    %c0_i32 = arith.constant 0 : i32
    %c0_i32_0 = arith.constant 0 : i32
    %c0_i32_1 = arith.constant 0 : i32
    return %c0_i32, %c0_i32_0 : i32, i32
  }
  func.func @transform_5(%arg0: i32, %arg1: i32) -> (i32, i32, i32) {
    %c0_i32 = arith.constant 0 : i32
    %c0_i32_0 = arith.constant 0 : i32
    %c0_i32_1 = arith.constant 0 : i32
    return %arg0, %c0_i32, %c0_i32_0 : i32, i32, i32
  }
}

</mosaic_0001>

<bundles_post_ra>
// kernel: affinity_2d_predictor.1
= control target key start
LH: loop header
LB: loop body
LE: loop exit
PB: predicated region body
PF: predicated region fallthrough
CT: control target
= control target key end

     0   :  { %10 = vsyncpa [#allocation6], 0  ;;  %s1727_s0 = inlined_call_operand.vmem [shape: f32[2,126,34], index: 0, kind: input, shape index: {}]   ;;  %s1728_s1 = inlined_call_operand.vmem [shape: f32[34,33], index: 1, kind: input, shape index: {}]   ;;  %s1729_s2 = inlined_call_operand.vmem [shape: f32[1,32], index: 2, kind: input, shape index: {}]   ;;  %s1730_s3 = inlined_call_operand.vmem [shape: f32[32,16], index: 3, kind: input, shape index: {}]   ;;  %s1731_s4 = inlined_call_operand.vmem [shape: f32[1,16], index: 4, kind: input, shape index: {}]   ;;  %s1732_s5 = inlined_call_operand.hbm [shape: f32[2,1,16], index: 5, kind: output, shape index: {}]  }
   0x1   :  { %12 = vsyncpa [#allocation6 + $0x1], 0  ;;  %s1309_s18 = smov 0   ;;  %s1311_s19 = smov 0  }
   0x2   :  { %s1313_s20 = smov 0   ;;  %s1315_s21 = smov 0  }
   0x3   :  { %s1317_s22 = smov 0   ;;  %s1319_s23 = smov 0  }
   0x4   :  { %s1321_s24 = smov 0   ;;  %s1323_s25 = smov 0  }
   0x5 LB: > { %s957_s26 = sadd.s32 4294967295, %s1263_s25   ;;  %s958_s27 = sadd.s32 4294967294, %s1263_s25   ;;  %s1263_s25 = sphi %s1323_s25, %s18_s25   ;;  %s1259_s24 = sphi %s1321_s24, %s1757_s24   ;;  %s1255_s23 = sphi %s1319_s23, %s1756_s23   ;;  %s1251_s22 = sphi %s1317_s22, %s1755_s22   ;;  %s1247_s21 = sphi %s1315_s21, %s1754_s21   ;;  %s1243_s20 = sphi %s1313_s20, %s1753_s20   ;;  %s1239_s19 = sphi %s1311_s19, %s1752_s19   ;;  %s1235_s18 = sphi %s1309_s18, %s1751_s18  }
   0x6   : > { %s27_s28 = sadd.s32 1, %s1255_s23  ;;  %s30_s29 = sadd.s32 1, %s1259_s24 }
   0x7   : > { %p28_p0 = scmp.ge.s32.totalorder %s27_s28, 2  ;;  %p159_p1 = scmp.ne.s32.totalorder %s1243_s20, %s1239_s19 }
   0x8   : > { %p160_p2 = scmp.eq.s32.totalorder %s957_s26, 3  ;;  %p165_p4 = scmp.ne.s32.totalorder %s1239_s19, %s1235_s18 }
   0x9   : > { %s1759_s28 = smov (%p28_p0, %s27_s28), 0  ;;  %s1761_s29 = smov (!%p28_p0, %s30_s29), %s1259_s24 }
   0xa   : > { %p1358_p3 = por %p160_p2, %p159_p1  ;;  %p32_p5 = scmp.ge.s32.totalorder %s1761_s29, 2 }
   0xb   : > { %p166_p6 = scmp.eq.s32.totalorder %s958_s27, 3  ;;  %p961_p7 = scmp.ge.s32.totalorder %s1263_s25, 1 }
   0xc   : > { %p209_p8 = scmp.lt.s32.totalorder %s1263_s25, 5  ;;  %s1763_s29 = smov (%p32_p5, %s1761_s29), 0 }
   0xd   : > { %p1368_p9 = por %p166_p6, %p165_p4  ;;  %s146_s7 = ssub.s32 %s1259_s24, %s1763_s29 }
   0xe   : > { %p210_p10 = pnand %p961_p7, %p209_p8  ;;  %s149_s8 = sadd.s32 1, %s1243_s20 }
   0xf   : > { %p147_p11 = scmp.eq.s32.totalorder %s146_s7, 0  ;;  %s238_s10 = sand.u32 (!%p210_p10), 1, %s1239_s19  }
  0x10   : > { %213 = sbr.rel (%p210_p10) target bundleno = 1335 (0x537), region = 40  ;;  %s962_s11 = sshll.u32 (!%p210_p10), %s1247_s21, 3 }
  0x11   : > { %s1376_s9 = scalar_select %p147_p11, %s1243_s20, %s149_s8  }
  0x12   : > { %p241_p12 = scmp.lt.s32.totalorder (!%p210_p10), %s1251_s22, 1  ;;  %p243_p13 = scmp.lt.s32.totalorder (!%p210_p10), %s962_s11, 15 }
  0x13   : > { %s1389_s27 = scalar_lea.vmem (!%p210_p10), [#allocation5], %s238_s10  ;;  %p965_p0 = scmp.ne.s32.totalorder (!%p210_p10), %s1247_s21, 0 }
  0x17   : > { %s242_s12 = scalar_select %p241_p12, %s1251_s22, 1 }
  0x18   : > { %s1765_s11 = smov (!%p243_p13, %s962_s11), 15  ;;  %253 = sbr.rel (%p965_p0) target bundleno = 31 (0x1f), region = 44 }
  0x19   : > { %s963_s13 = sshll.u32 %s242_s12, 4  ;;  %vm254_vm0 = vcmask (!%p965_p0), 0   ;;  %vm257_vm1 = vcmask (!%p965_p0), 253952   ;;  %v1265_v0 = vmov (!%p965_p0), -1e+30   ;;  %v1266_v1 = vmov (!%p965_p0), 0.0  }
  0x1a   : > { %s246_s14 = sadd.s32 %s963_s13, %s1765_s11  ;;  %255 = vst.msk [vmem:[#allocation2] sm:$0x1] (!%p965_p0), %vm254_vm0, %v1265_v0  ;;  %256 = vst.msk [vmem:[#allocation3] sm:$0x1] (!%p965_p0), %vm254_vm0, %v1266_v1 }
  0x1b   : > { %s964_s15 = sshll.u32 %s246_s14, 3  ;;  %258 = vst.msk [vmem:[#allocation4] sm:$0x1] (!%p965_p0), %vm257_vm1, %v1266_v1 }
  0x1c   : > { %s1385_s26 = scalar_lea.vmem %s1727_s0, %s964_s15 }
  0x1f PF: > { %v1393_v2 = vld [vmem:[%s1385_s26] sm:$0xff]  ;;  %s966_s7 = sshll.u32 %s1247_s21, 6  ;;  %v268_v3 = vlaneseq  ;;  %v1397_v4 = vld [vmem:[%s1385_s26 + $0x8] sm:$0xff]  ;;  %v1267_v6 = vmov 33   ;;  %v1417_v14 = vld [vmem:[%s1385_s26 + $0x10] sm:$0xff]  ;;  %v1268_v31 = vmov 0  }
  0x20   : > { %v1400_v5 = vld [vmem:[%s1385_s26 + $0x20] sm:$0xff]  ;;  %1144 = vset.pattern.permute.xlu0 %v1267_v6  ;;  %v277_v7 = vstv %s966_s7  ;;  %1145 = vset.pattern.permute.xlu1 %v1267_v6  ;;  %vm294_vm2 = vcmp.gt.f32.partialorder %v1393_v2, 0.5  ;;  %vm295_vm3 = vcmp.gt.f32.partialorder %v1397_v4, 0.5  ;;  %v1413_v12 = vld [vmem:[%s1385_s26 + $0x28] sm:$0xff]  ;;  %v1424_v22 = vld [vmem:[%s1385_s26 + $0x30] sm:$0xff]  ;;  %vm296_vm13 = vcmp.gt.f32.partialorder %v1417_v14, 0.5 }
  0x21   : > { %v1404_v8 = vshrl.u32 %v268_v3, 7  ;;  %vm298_vm4 = vcmp.gt.f32.partialorder %v1400_v5, 0.5  ;;  %v366_v23 = vld [vmem:[%s1728_s1] sm:$0xff]  ;;  %v367_v24 = vld [vmem:[%s1728_s1 + $0x8] sm:$0xff]  ;;  %vm299_vm7 = vcmp.gt.f32.partialorder %v1413_v12, 0.5  ;;  %v368_v29 = vld [vmem:[%s1728_s1 + $0x10] sm:$0xff] }
  0x22   : > { %v369_v30 = vld [vmem:[%s1728_s1 + $0x18] sm:$0xff]  ;;  %vm300_vm14 = vcmp.gt.f32.partialorder %v1424_v22, 0.5  ;;  %v1040_v38 = vpack.c.bf16 %v367_v24, %v366_v23  ;;  %v370_v48 = vld [vmem:[%s1728_s1 + $0x20] sm:$0x3]  ;;  %s1269_s8 = smov 1   ;;  %s1271_s11 = smov 95  }
  0x23   : > { %v278_v9 = vadd.s32 %v277_v7, %v1404_v8  ;;  %v270_v10 = vadd.s32 8, %v1404_v8  ;;  %v273_v11 = vadd.s32 32, %v1404_v8  ;;  %v274_v13 = vadd.s32 40, %v1404_v8  ;;  %v1457_v34 = vld [vmem:[%s1385_s26 + $0x18] sm:$0xff]  ;;  %s1272_s12 = smov 33   ;;  %p984_p1 = scmp.ne.s32.totalorder %s1247_s21, 1 }
  0x24   : > { %v271_v15 = vadd.s32 16, %v1404_v8  ;;  %v275_v16 = vadd.s32 48, %v1404_v8  ;;  %v272_v17 = vadd.s32 24, %v1404_v8  ;;  %v276_v18 = vadd.s32 56, %v1404_v8  ;;  %v1479_v42 = vld [vmem:[%s1385_s26 + $0x38] sm:$0xff]  ;;  %1041 = vmatprep.subr.bf16.mxu0 %v1040_v38  ;;  %1054 = vmatprep.subr.bf16.mxu1 %v1040_v38 }
  0x25   : > { %vm286_vm5 = vcmp.lt.s32.totalorder %v278_v9, 126  ;;  %v279_v19 = vadd.s32 %v277_v7, %v270_v10  ;;  %v282_v20 = vadd.s32 %v277_v7, %v273_v11  ;;  %v283_v21 = vadd.s32 %v277_v7, %v274_v13  ;;  %1043 = vmatpush3.bf16.msra.mxu0 %v1040_v38  ;;  %1057 = vmatpush3.bf16.msra.mxu1 %v1040_v38 }
  0x26   : > { %vm1434_vm6 = vmand %vm286_vm5, %vm294_vm2  ;;  %v280_v26 = vadd.s32 %v277_v7, %v271_v15  ;;  %v284_v27 = vadd.s32 %v277_v7, %v275_v16  ;;  %v281_v28 = vadd.s32 %v277_v7, %v272_v17  ;;  %v285_v35 = vadd.s32 %v277_v7, %v276_v18 }
  0x27   : > { %v310_v32 = vsel %vm1434_vm6, 1, %v1268_v31  ;;  %vm287_vm8 = vcmp.lt.s32.totalorder %v279_v19, 126  ;;  %vm290_vm9 = vcmp.lt.s32.totalorder %v282_v20, 126  ;;  %vm291_vm10 = vcmp.lt.s32.totalorder %v283_v21, 126 }
  0x28   : > { %327 = vperm.xlu0 %1144, %v310_v32   ;;  %vm1450_vm11 = vmand %vm287_vm8, %vm295_vm3  ;;  %vm288_vm12 = vcmp.lt.s32.totalorder %v280_v26, 126  ;;  %vm292_vm0 = vcmp.lt.s32.totalorder %v284_v27, 126  ;;  %v1044_v39 = vpack.c.bf16 %v369_v30, %v368_v29  ;;  %vm289_vm3 = vcmp.lt.s32.totalorder %v281_v28, 126 }
  0x29   : > { %v311_v36 = vsel %vm1450_vm11, 1, %v1268_v31  ;;  %vm1464_vm15 = vmand %vm290_vm9, %vm298_vm4  ;;  %vm297_vm4 = vcmp.gt.f32.partialorder %v1457_v34, 0.5  ;;  %vm301_vm8 = vcmp.gt.f32.partialorder %v1479_v42, 0.5 }
  0x2a   : > { %330 = vperm.xlu1 %1145, %v311_v36   ;;  %v314_v40 = vsel %vm1464_vm15, 1, %v1268_v31  ;;  %vm1474_vm1 = vmand %vm291_vm10, %vm299_vm7  ;;  %vm293_vm7 = vcmp.lt.s32.totalorder %v285_v35, 126  ;;  %1045 = vmatprep.subr.bf16.mxu0 %v1044_v39  ;;  %vm396_vm10 = vcmask 1041408  }
  0x2b   : > { %v315_v43 = vsel %vm1474_vm1, 1, %v1268_v31  ;;  %vm1485_vm2 = vmand %vm288_vm12, %vm296_vm13  ;;  %1055 = vmatprep.subr.bf16.mxu1 %v1044_v39  ;;  %1047 = vmatpush3.bf16.msra.mxu0 %v1044_v39  ;;  %vm371_vm13 = vcmask 277504  }
  0x2c   : > { %339 = vperm.xlu0 %1144, %v314_v40   ;;  %vm1492_vm5 = vmand %vm292_vm0, %vm300_vm14  ;;  %v312_v46 = vsel %vm1485_vm2, 1, %v1268_v31  ;;  %1015 = vmatprep.subr.msk.mxu0 %vm396_vm10, %v370_v48 }
  0x2d   : > { %vm1500_vm9 = vmand %vm289_vm3, %vm297_vm4  ;;  %v316_v49 = vsel %vm1492_vm5, 1, %v1268_v31  ;;  %1058 = vmatpush3.bf16.msra.mxu1 %v1044_v39 }
  0x2e   : > { %342 = vperm.xlu1 %1145, %v315_v43   ;;  %vm1510_vm12 = vmand %vm293_vm7, %vm301_vm8  ;;  %v313_v51 = vsel %vm1500_vm9, 1, %v1268_v31  ;;  %1056 = vmatprep.subr.msk.mxu1 %vm396_vm10, %v370_v48 }
  0x2f   : > { %v317_v52 = vsel %vm1510_vm12, 1, %v1268_v31  ;;  %1016 = vmatpush3.msk.msra.mxu0 %vm396_vm10, %v370_v48 }
  0x30   : > { %333 = vperm.xlu0 %1144, %v312_v46  }
  0x31   : > { %1059 = vmatpush3.msk.msra.mxu1 %vm396_vm10, %v370_v48 }
  0x32   : > { %345 = vperm.xlu1 %1145, %v316_v49  }
  0x34   : > { %336 = vperm.xlu0 %1144, %v313_v51  }
  0x36   : > { %348 = vperm.xlu1 %1145, %v317_v52  }
  0xa7   : > { %v328_v53 = vpop.permute.xlu0 %327 }
  0xa8   : > { %vm350_vm14 = vcmp.eq.s32.totalorder %v328_v53, 1 }
  0xa9   : > { %v331_v54 = vpop.permute.xlu1 %330  ;;  %v358_v55 = vsel %vm350_vm14, %v1393_v2, 0.0 }
  0xaa   : > { %vm351_vm0 = vcmp.eq.s32.totalorder %v331_v54, 1  ;;  %1017 = vmatprep.mubr.msk.f32.mxu0 %vm371_vm13, %v358_v55 }
  0xab   : > { %v359_v56 = vsel %vm351_vm0, %v1397_v4, 0.0  ;;  %v340_v57 = vpop.permute.xlu0 %339  ;;  %vm672_vm0 = vcmask 0  }
  0xac   : > { %vm354_vm3 = vcmp.eq.s32.totalorder %v340_v57, 1  ;;  %1018 = vmatmul.mubr.msk.f32.vlgmr.msra.gmra.mrb[0].mxu0 %vm371_vm13, %v359_v56  ;;  %v1270_v56 = vmov 1966171168  }
  0xad   : > { %v343_v58 = vpop.permute.xlu1 %342  ;;  %v362_v59 = vsel %vm354_vm3, %v1400_v5, 0.0  ;;  %v570_v57 = vunpack.c.l.s4 %v1270_v56 }
  0xae   : > { %vm355_vm4 = vcmp.eq.s32.totalorder %v343_v58, 1  ;;  %1023 = vmatprep.mubr.msk.f32.mxu1 %vm371_vm13, %v362_v59 }
  0xaf   : > { %v363_v60 = vsel %vm355_vm4, %v1413_v12, 0.0  ;;  %v334_v61 = vpop.permute.xlu0 %333 }
  0xb0   : > { %vm352_vm7 = vcmp.eq.s32.totalorder %v334_v61, 1  ;;  %1024 = vmatmul.mubr.msk.f32.vlgmr.msra.gmra.mrb[0].mxu1 %vm371_vm13, %v363_v60  ;;  %v571_v60 = vunpack.c.0.s8 %v570_v57 }
  0xb1   : > { %v360_v62 = vsel %vm352_vm7, %v1417_v14, 0.0  ;;  %v346_v63 = vpop.permute.xlu1 %345 }
  0xb2   : > { %vm356_vm8 = vcmp.eq.s32.totalorder %v346_v63, 1  ;;  %1020 = vmatprep.mubr.msk.f32.mxu0 %vm371_vm13, %v360_v62  ;;  %v1591_v63 = vsub.s32 %v571_v60, %v1404_v8 }
  0xb3   : > { %v364_v0 = vsel %vm356_vm8, %v1424_v22, 0.0  ;;  %v337_v1 = vpop.permute.xlu0 %336 }
  0xb4   : > { %vm353_vm10 = vcmp.eq.s32.totalorder %v337_v1, 1  ;;  %1026 = vmatprep.mubr.msk.f32.mxu1 %vm371_vm13, %v364_v0 }
  0xb5   : > { %v361_v2 = vsel %vm353_vm10, %v1457_v34, 0.0  ;;  %v349_v3 = vpop.permute.xlu1 %348 }
  0xb6   : > { %vm357_vm14 = vcmp.eq.s32.totalorder %v349_v3, 1  ;;  %1021 = vmatmul.mubr.msk.f32.gmra.mrb[2].mxu0 %vm371_vm13, %v361_v2  ;;  %v545_v3 = vld [vmem:[#allocation2] sm:$0x1] }
  0xb7   : > { %v365_v4 = vsel %vm357_vm14, %v1479_v42, 0.0 }
  0xb8   : > { %1027 = vmatmul.mubr.msk.f32.gmra.mrb[2].mxu1 %vm371_vm13, %v365_v4  ;;  %vm546_vm13 = vcmask 277768   ;;  %v1597_v4 = vsub.s32 0, %v1404_v8 }
 0x17f   : > { %v1536_v5 = vpop.f32.mrb[0].mxu0 }
 0x180   : > { %515 = vrot.lane.b32.xlu1 %v1536_v5, %s1269_s8  ;;  %v1539_v7 = vpop.f32.mrb[1].mxu0 }
 0x181   : > { %513 = vrot.lane.b32.xlu0 %v1539_v7, %s1269_s8 }
 0x183   : > { %v1542_v9 = vpop.f32.mrb[0].mxu1 }
 0x184   : > { %523 = vrot.lane.b32.xlu1 %v1542_v9, %s1269_s8  ;;  %v1545_v10 = vpop.f32.mrb[1].mxu1 }
 0x185   : > { %521 = vrot.lane.b32.xlu0 %v1545_v10, %s1269_s8 }
 0x189   : > { %v1548_v11 = vpop.f32.mrb[2].mxu0 }
 0x18a   : > { %519 = vrot.lane.b32.xlu1 %v1548_v11, %s1269_s8  ;;  %v1551_v12 = vpop.f32.mrb[3].mxu0 }
 0x18b   : > { %v1553_v13 = vpop.f32.mrb[2].mxu1  ;;  %517 = vrot.lane.b32.xlu0 %v1551_v12, %s1269_s8 }
 0x18c   : > { %v1556_v14 = vpop.f32.mrb[3].mxu1 }
 0x18e   : > { %527 = vrot.lane.b32.xlu1 %v1553_v13, %s1269_s8 }
 0x18f   : > { %525 = vrot.lane.b32.xlu0 %v1556_v14, %s1269_s8 }
 0x1f2   : > { %v516_v15 = vpop.permute.xlu1 %515 }
 0x1f3   : > { %v514_v16 = vpop.permute.xlu0 %513  ;;  %v538_v22 = vsel %vm1450_vm11, %v516_v15, -1e+30 }
 0x1f4   : > { %v537_v24 = vsel %vm1434_vm6, %v514_v16, -1e+30  ;;  %v548_v29 = vsel %vm546_vm13, %v538_v22, -inf }
 0x1f5   : > { %v547_v34 = vsel %vm546_vm13, %v537_v24, -inf }
 0x1f6   : > { %v524_v17 = vpop.permute.xlu1 %523 }
 0x1f7   : > { %v522_v18 = vpop.permute.xlu0 %521  ;;  %v1562_v19 = vsel %vm1474_vm1, %v524_v17, -1e+30 }
 0x1f8   : > { %v1566_v20 = vsel %vm1464_vm15, %v522_v18, -1e+30  ;;  %v553_v26 = vsel %vm546_vm13, %v1562_v19, -inf }
 0x1f9   : > { %v551_v27 = vsel %vm546_vm13, %v1566_v20, -inf  ;;  %v554_v35 = vmax.f32 %v548_v29, %v553_v26 }
 0x1fa   : > { %v552_v39 = vmax.f32 %v547_v34, %v551_v27 }
 0x1fc   : > { %v520_v21 = vpop.permute.xlu1 %519  ;;  %v559_v52 = vmax.f32 %v552_v39, %v554_v35 }
 0x1fd   : > { %v518_v23 = vpop.permute.xlu0 %517  ;;  %v540_v28 = vsel %vm1500_vm9, %v520_v21, -1e+30 }
 0x1fe   : > { %v539_v30 = vsel %vm1485_vm2, %v518_v23, -1e+30  ;;  %v550_v40 = vsel %vm546_vm13, %v540_v28, -inf }
 0x1ff   : > { %v549_v46 = vsel %vm546_vm13, %v539_v30, -inf }
 0x200   : > { %v528_v32 = vpop.permute.xlu1 %527 }
 0x201   : > { %v544_v36 = vsel %vm1510_vm12, %v528_v32, -1e+30  ;;  %v526_v38 = vpop.permute.xlu0 %525 }
 0x202   : > { %v557_v42 = vsel %vm546_vm13, %v544_v36, -inf  ;;  %v543_v43 = vsel %vm1492_vm5, %v526_v38, -1e+30 }
 0x203   : > { %v558_v48 = vmax.f32 %v550_v40, %v557_v42  ;;  %v555_v49 = vsel %vm546_vm13, %v543_v43, -inf }
 0x204   : > { %v556_v51 = vmax.f32 %v549_v46, %v555_v49 }
 0x206   : > { %v560_v53 = vmax.f32 %v556_v51, %v558_v48 }
 0x208   : > { %v561_v54 = vmax.f32 %v559_v52, %v560_v53 }
 0x20a   : > { %v562_v55 = vrot.slane %v561_v54, 4 }
 0x20c   : > { %v563_v58 = vmax.f32 %v561_v54, %v562_v55 }
 0x20e   : > { %v564_v59 = vrot.slane %v563_v58, 2 }
 0x210   : > { %v565_v61 = vmax.f32 %v563_v58, %v564_v59 }
 0x212   : > { %v566_v62 = vrot.slane %v565_v61, 1 }
 0x214   : > { %v567_v0 = vmax.f32 %v565_v61, %v566_v62 }
 0x216   : > { %v575_v1 = vrot.slane %v567_v0, %v1591_v63 }
 0x218   : > { %v582_v2 = vrot.slane %v575_v1, %v1591_v63 }
 0x21a   : > { %583 = vrot.lane.b32.xlu0 %v582_v2, %s1271_s11 }
 0x28c   : > { %v584_v15 = vpop.permute.xlu0 %583 }
 0x28d   : > { %v586_v16 = vmax.f32 %v545_v3, %v584_v15 }
 0x28f   : > { %v587_v17 = vsub.f32 %v545_v3, %v586_v16  ;;  %758 = vst.msk [vmem:[#allocation2] sm:$0x1] %vm672_vm0, %v586_v16  ;;  %v594_v18 = vrot.slane %v586_v16, %v1597_v4 }
 0x291   : > { %595 = vrot.lane.b32.xlu1 %v594_v18, %s1272_s12  ;;  %v588_v60 = vmul.f32 1.442695, %v587_v17 }
 0x303   : > { %v596_v21 = vpop.permute.xlu1 %595 }
 0x304   : > { %v599_v23 = vsub.f32 %v538_v22, %v596_v21  ;;  %v598_v26 = vsub.f32 %v537_v24, %v596_v21  ;;  %v601_v27 = vsub.f32 %v540_v28, %v596_v21  ;;  %v600_v29 = vsub.f32 %v539_v30, %v596_v21 }
 0x305   : > { %v603_v32 = vsub.f32 %v1562_v19, %v596_v21  ;;  %v602_v8 = vsub.f32 %v1566_v20, %v596_v21  ;;  %v604_v40 = vsub.f32 %v543_v43, %v596_v21  ;;  %v605_v48 = vsub.f32 %v544_v36, %v596_v21 }
 0x306   : > { %v608_v34 = vmul.f32 1.442695, %v599_v23  ;;  %v606_v35 = vmul.f32 1.442695, %v598_v26  ;;  %v612_v38 = vmul.f32 1.442695, %v601_v27 }
 0x307   : > { %v610_v39 = vmul.f32 1.442695, %v600_v29  ;;  %v616_v42 = vmul.f32 1.442695, %v603_v32  ;;  %v614_v46 = vmul.f32 1.442695, %v602_v8 }
 0x308   : > { %1148 = vpow2.f32 %v608_v34  ;;  %v618_v22 = vmul.f32 1.442695, %v604_v40  ;;  %v620_v24 = vmul.f32 1.442695, %v605_v48  ;;  %v1273_v19 = vmov 0.0  }
 0x309   : > { %1150 = vpow2.f32 %v606_v35  ;;  %v968_v20 = vsel %vm1450_vm11, 1.0, %v1273_v19  ;;  %v967_v28 = vsel %vm1434_vm6, 1.0, %v1273_v19  ;;  %v970_v36 = vsel %vm1500_vm9, 1.0, %v1273_v19 }
 0x30a   : > { %1152 = vpow2.f32 %v612_v38  ;;  %v969_v51 = vsel %vm1485_vm2, 1.0, %v1273_v19  ;;  %v971_v25 = vsel %vm1464_vm15, 1.0, %v1273_v19  ;;  %v972_v44 = vsel %vm1474_vm1, 1.0, %v1273_v19 }
 0x30b   : > { %1154 = vpow2.f32 %v610_v39  ;;  %v973_v37 = vsel %vm1492_vm5, 1.0, %v1273_v19  ;;  %v974_v41 = vsel %vm1510_vm12, 1.0, %v1273_v19  ;;  %vm733_vm6 = vcmask 261120  }
 0x30c   : > { %1156 = vpow2.f32 %v616_v42  ;;  %vm756_vm11 = vcmask 253952   ;;  %vm1277_vm1 = vmmov (!%p984_p1), 0   ;;  %vm870_vm2 = vcmask (!%p984_p1), 122880  }
 0x30d   : > { %1158 = vpow2.f32 %v614_v46 }
 0x30e   : > { %1160 = vpow2.f32 %v618_v22 }
 0x30f   : > { %1162 = vpow2.f32 %v620_v24 }
 0x310   : > { %1164 = vpow2.f32 %v588_v60 }
 0x312   : > { %v1149_v30 = vpop.eup %1148 }
 0x313   : > { %v1151_v43 = vpop.eup %1150  ;;  %v623_v49 = vmul.f32 %v1149_v30, %v968_v20 }
 0x314   : > { %v1153_v52 = vpop.eup %1152  ;;  %v622_v53 = vmul.f32 %v1151_v43, %v967_v28 }
 0x315   : > { %v1155_v54 = vpop.eup %1154  ;;  %692 = vperm.xlu1 %1145, %v623_v49   ;;  %v633_v33 = vsel %vm546_vm13, %v623_v49, 0.0  ;;  %v625_v57 = vmul.f32 %v1153_v52, %v970_v36 }
 0x316   : > { %v1157_v55 = vpop.eup %1156  ;;  %687 = vperm.xlu0 %1144, %v622_v53   ;;  %v632_v56 = vsel %vm546_vm13, %v622_v53, 0.0  ;;  %v624_v58 = vmul.f32 %v1155_v54, %v969_v51 }
 0x317   : > { %v1159_v47 = vpop.eup %1158  ;;  %v634_v59 = vadd.f32 %v633_v33, %v632_v56  ;;  %v637_v2 = vsel %vm546_vm13, %v625_v57, 0.0  ;;  %v627_v3 = vmul.f32 %v1157_v55, %v972_v44 }
 0x318   : > { %v635_v61 = vsel %vm546_vm13, %v624_v58, 0.0  ;;  %v626_v62 = vmul.f32 %v1159_v47, %v971_v25  ;;  %v1161_v0 = vpop.eup %1160 }
 0x319   : > { %702 = vperm.xlu1 %1145, %v625_v57   ;;  %v636_v1 = vadd.f32 %v635_v61, %v634_v59  ;;  %v1163_v15 = vpop.eup %1162  ;;  %v628_v18 = vmul.f32 %v1161_v0, %v973_v37  ;;  %v641_v23 = vsel %vm546_vm13, %v627_v3, 0.0  ;;  %v630_v59 = vld [vmem:[#allocation3] sm:$0x1] }
 0x31a   : > { %697 = vperm.xlu0 %1144, %v624_v58   ;;  %v639_v17 = vsel %vm546_vm13, %v626_v62, 0.0  ;;  %v629_v45 = vmul.f32 %v1163_v15, %v974_v41  ;;  %v1165_v34 = vpop.eup %1164  ;;  %v674_v15 = vld [vmem:[#allocation4] sm:$0x1] }
 0x31b   : > { %v638_v16 = vadd.f32 %v637_v2, %v636_v1  ;;  %v643_v27 = vsel %vm546_vm13, %v628_v18, 0.0 }
 0x31c   : > { %v645_v32 = vsel %vm546_vm13, %v629_v45, 0.0 }
 0x31d   : > { %712 = vperm.xlu1 %1145, %v627_v3   ;;  %v640_v21 = vadd.f32 %v639_v17, %v638_v16 }
 0x31e   : > { %707 = vperm.xlu0 %1144, %v626_v62  }
 0x31f   : > { %v642_v26 = vadd.f32 %v641_v23, %v640_v21  ;;  %v1274_v23 = vmov (!%p984_p1), 0  }
 0x321   : > { %722 = vperm.xlu1 %1145, %v629_v45   ;;  %v644_v29 = vadd.f32 %v643_v27, %v642_v26  ;;  %v792_v27 = vld [vmem:[%s1730_s3] sm:$0xff] (!%p984_p1) }
 0x322   : > { %717 = vperm.xlu0 %1144, %v628_v18  }
 0x323   : > { %v646_v50 = vadd.f32 %v645_v32, %v644_v29  ;;  %v793_v29 = vld [vmem:[%s1730_s3 + $0x8] sm:$0xff] (!%p984_p1)  ;;  %v1275_v32 = vmov (!%p984_p1), 0.0  }
 0x324   : > { %1037 = vmatprep.mubr.msk.f32.mxu0 (!%p984_p1), %vm1277_vm1, %v1275_v32 }
 0x325   : > { %v647_v8 = vrot.slane %v646_v50, 4 }
 0x326   : > { %1146 = vset.pattern.permute.xlu0 %v1268_v31 }
 0x327   : > { %v648_v35 = vadd.f32 %v647_v8, %v646_v50  ;;  %677 = vperm.xlu0 %1146, %v1165_v34   ;;  %v1049_v8 = vpack.c.bf16 (!%p984_p1), %v793_v29, %v792_v27 }
 0x329   : > { %v649_v38 = vrot.slane %v648_v35, 2 }
 0x32b   : > { %v650_v39 = vadd.f32 %v649_v38, %v648_v35  ;;  %1147 = vset.pattern.permute.xlu0 %v1267_v6  ;;  %v794_v35 = vld [vmem:[%s1730_s3 + $0x10] sm:$0xff] (!%p984_p1)  ;;  %v795_v38 = vld [vmem:[%s1730_s3 + $0x18] sm:$0xff] (!%p984_p1) }
 0x32c   : > { %1166 = vset.pattern.permute.xlu0 (!%p984_p1), %v1274_v23 }
 0x32d   : > { %v651_v40 = vrot.slane %v650_v39, 1 }
 0x32f   : > { %v652_v42 = vadd.f32 %v651_v40, %v650_v39  ;;  %v1052_v39 = vpack.c.bf16 (!%p984_p1), %v795_v38, %v794_v35 }
 0x331   : > { %v660_v46 = vrot.slane %v652_v42, %v1591_v63 }
 0x333   : > { %v667_v48 = vrot.slane %v660_v46, %v1591_v63 }
 0x335   : > { %668 = vrot.lane.b32.xlu1 %v667_v48, %s1271_s11  ;;  %v780_v48 = vld [vmem:[%s1729_s2] sm:$0x1] (!%p984_p1) }
 0x394   : > { %v693_v22 = vpop.permute.xlu1 %692 }
 0x395   : > { %v726_v24 = vmul.f32 %v1536_v5, %v693_v22  ;;  %v688_v19 = vpop.permute.xlu0 %687 }
 0x396   : > { %v725_v31 = vmul.f32 %v688_v19, %v1539_v7 }
 0x397   : > { %v735_v20 = vsel %vm733_vm6, %v726_v24, 0.0 }
 0x398   : > { %v734_v28 = vsel %vm733_vm6, %v725_v31, 0.0  ;;  %v703_v6 = vpop.permute.xlu1 %702 }
 0x399   : > { %v736_v30 = vadd.f32 %v735_v20, %v734_v28  ;;  %v698_v43 = vpop.permute.xlu0 %697  ;;  %v728_v49 = vmul.f32 %v1548_v11, %v703_v6  ;;  %v796_v28 = vld [vmem:[%s1731_s4] sm:$0x1] (!%p984_p1) }
 0x39a   : > { %v727_v63 = vmul.f32 %v698_v43, %v1551_v12 }
 0x39b   : > { %v739_v5 = vsel %vm733_vm6, %v728_v49, 0.0 }
 0x39c   : > { %v737_v36 = vsel %vm733_vm6, %v727_v63, 0.0  ;;  %v713_v51 = vpop.permute.xlu1 %712 }
 0x39d   : > { %v738_v52 = vadd.f32 %v737_v36, %v736_v30  ;;  %v708_v53 = vpop.permute.xlu0 %707  ;;  %v730_v7 = vmul.f32 %v1542_v9, %v713_v51 }
 0x39e   : > { %v729_v54 = vmul.f32 %v708_v53, %v1545_v10  ;;  %v631_v10 = vmul.f32 %v1165_v34, %v630_v59  ;;  %v1276_v34 = vmov (!%p984_p1), 0.0|0.0  }
 0x39f   : > { %v740_v33 = vadd.f32 %v739_v5, %v738_v52  ;;  %v743_v11 = vsel %vm733_vm6, %v730_v7, 0.0  ;;  %1048 = vmatprep.subr.bf16.mxu0 (!%p984_p1), %v1276_v34 }
 0x3a0   : > { %v741_v25 = vsel %vm733_vm6, %v729_v54, 0.0  ;;  %v723_v55 = vpop.permute.xlu1 %722  ;;  %1050 = vmatpush3.bf16.msra.mxu0 (!%p984_p1), %v1049_v8 }
 0x3a1   : > { %v742_v56 = vadd.f32 %v741_v25, %v740_v33  ;;  %v718_v57 = vpop.permute.xlu0 %717  ;;  %v732_v12 = vmul.f32 %v1553_v13, %v723_v55  ;;  %1051 = vmatprep.subr.bf16.mxu0 (!%p984_p1), %v1276_v34 }
 0x3a2   : > { %v731_v58 = vmul.f32 %v718_v57, %v1556_v14 }
 0x3a3   : > { %v744_v47 = vadd.f32 %v743_v11, %v742_v56  ;;  %v747_v9 = vsel %vm733_vm6, %v732_v12, 0.0 }
 0x3a4   : > { %v745_v44 = vsel %vm733_vm6, %v731_v58, 0.0  ;;  %1053 = vmatpush3.bf16.msra.mxu0 (!%p984_p1), %v1052_v39 }
 0x3a5   : > { %v746_v60 = vadd.f32 %v745_v44, %v744_v47 }
 0x3a6   : > { %v678_v2 = vpop.permute.xlu0 %677 }
 0x3a7   : > { %v748_v61 = vadd.f32 %v747_v9, %v746_v60  ;;  %v669_v62 = vpop.permute.xlu1 %668  ;;  %v683_v14 = vrot.slane %v678_v2, %v1597_v4 }
 0x3a8   : > { %v671_v0 = vadd.f32 %v669_v62, %v631_v10 }
 0x3a9   : > { %v749_v1 = vrot.slane %v748_v61, 4  ;;  %v684_v17 = vmul.f32 %v683_v14, %v674_v15 }
 0x3aa   : > { %673 = vst.msk [vmem:[#allocation3] sm:$0x1] %vm672_vm0, %v671_v0 }
 0x3ab   : > { %v750_v37 = vadd.f32 %v749_v1, %v748_v61 }
 0x3ad   : > { %v751_v3 = vrot.slane %v750_v37, 2 }
 0x3af   : > { %v752_v13 = vadd.f32 %v751_v3, %v750_v37 }
 0x3b1   : > { %v753_v16 = vrot.slane %v752_v13, 1  ;;  %762 = sbr.rel (%p984_p1) target bundleno = 1311 (0x51f), region = 48  ;;  %v763_v21 = vld [vmem:[#allocation3] sm:$0x1] (!%p984_p1) }
 0x3b2   : > { %1167 = vrcp.f32 (!%p984_p1), %v763_v21  ;;  %vm764_vm15 = vcmp.gt.f32.partialorder (!%p984_p1), %v763_v21, 0.0 }
 0x3b3   : > { %v754_v41 = vadd.f32 %v753_v16, %v752_v13  ;;  %v768_v50 = vsel (!%p984_p1), %vm764_vm15, 1.0, %v1275_v32 }
 0x3b5   : > { %v755_v18 = vadd.f32 %v754_v41, %v684_v17 }
 0x3b7   : > { %757 = vst.msk [vmem:[#allocation4] sm:$0x1] %vm756_vm11, %v755_v18 }
 0x3bc   : > { %v1168_v45 = vpop.eup %1167 }
 0x3bd   : > { %v767_v26 = vsel %vm764_vm15, %v1168_v45, 0.0 }
 0x3be   : > { %772 = vperm.xlu0 %1166, %v767_v26   ;;  %v769_v46 = vld [vmem:[#allocation4] sm:$0x1] }
 0x3c2   : > { %783 = vperm.xlu0 %1166, %v768_v50  }
 0x43d   : > { %v773_v40 = vpop.permute.xlu0 %772 }
 0x43e   : > { %v778_v42 = vrot.slane %v773_v40, %v1597_v4 }
 0x440   : > { %v779_v19 = vmul.f32 %v778_v42, %v769_v46 }
 0x441   : > { %v784_v22 = vpop.permute.xlu0 %783 }
 0x442   : > { %v789_v24 = vrot.slane %v784_v22, %v1597_v4 }
 0x444   : > { %v790_v31 = vmul.f32 %v789_v24, %v780_v48 }
 0x446   : > { %v791_v20 = vadd.f32 %v790_v31, %v779_v19 }
 0x448   : > { %1038 = vmatmul.mubr.msk.f32.vlgmr.msra.gmra.mrb[0].mxu0 %vm733_vm6, %v791_v20 }
 0x51b   : > { %v866_v6 = vpop.f32.mrb[0].mxu0 }
 0x51c   : > { %v867_v30 = vadd.f32 %v866_v6, %v796_v28  ;;  %v1039_v43 = vpop.f32.mrb[1].mxu0 }
 0x51e   : > { %871 = vst.msk [vmem:[%s1389_s27] sm:$0x1] %vm870_vm2, %v867_v30 }
 0x51f PF: > { %s986_s14 = sshll.u32 %s1251_s22, 4  ;;  %s885_s17 = sshll.u32 %s1389_s27, 4  ;;  %s886_s17 = int_to_ptr.vmem [resolvable:$true] %s885_s17 }
 0x520   : > { %s1677_s21 = scalar_lea.hbm %s1732_s5, %s986_s14  ;;  %s873_s26 = scalar_lea.sflag [#allocation6], %s238_s10 }
 0x521   : > { %s1169_s7 = scalar_lea.vmem %s886_s17, 16  ;;  %s1278_s8 = smov [#allocation5]  }
 0x522   : > { %p1170_p2 = scmp.ne.s32.totalorder %s886_s17, %s1169_s7  ;;  %s1173_s11 = sshll.u32 %s1278_s8, 4  ;;  %s1174_s11 = int_to_ptr.vmem [resolvable:$false] %s1173_s11 }
 0x523   : > { %s1175_s12 = scalar_lea.vmem %s1174_s11, 32  ;;  %p1176_p6 = scmp.lt.s32.totalorder %s886_s17, %s1174_s11 }
 0x524   : > { %p1171_p4 = pnand %p1170_p2, %p1358_p3  ;;  %p1177_p7 = scmp.lt.s32.totalorder %s1175_s12, %s1169_s7 }
 0x526   : > { %p1172_p5 = pneg %p1171_p4  ;;  %p1178_p8 = por %p1177_p7, %p1176_p6 }
 0x528   : > { %p1179_p10 = pnand %p1178_p8, %p1172_p5 }
 0x52a   : > { %1182 = shalt.err (!%p1179_p10)
}
 0x52b   : > { %s1183_s22 = scalar_lea.hbm %s1677_s21, 16  ;;  %s1187_s13 = scalar_lea.hbm %s1732_s5, 32 }
 0x52c   : > { %p1184_p11 = scmp.ne.s32.totalorder %s1677_s21, %s1183_s22  ;;  %p1188_p0 = scmp.lt.u32.totalorder %s1677_s21, %s1732_s5 }
 0x52d   : > { %p1189_p1 = scmp.lt.u32.totalorder %s1187_s13, %s1183_s22  ;;  %p1191_p4 = scmp.lt.u32.totalorder %s1183_s22, %s1677_s21 }
 0x52e   : > { %p1185_p12 = pnand %p1184_p11, %p1358_p3 }
 0x52f   : > { %p1190_p2 = por %p1189_p1, %p1188_p0 }
 0x530   : > { %p1186_p13 = pneg %p1185_p12 }
 0x531   : > { %p1192_p5 = por %p1191_p4, %p1190_p2 }
 0x533   : > { %p1193_p6 = pnand %p1192_p5, %p1186_p13 }
 0x535   : > { %1196 = shalt.err (!%p1193_p6)
}
 0x536   : > { %1060 = dma.vmem_to_hbm [thread:$0]  (%p1358_p3), %s886_s17, 16, %s1677_s21, %s873_s26  }
 0x537 PF: > { %p1066_p7 = scmp.ge.s32.totalorder %s1263_s25, 2  ;;  %s897_s16 = sand.u32 1, %s1235_s18  }
 0x538   : > { %s898_s7 = scalar_lea.sflag [#allocation6], %s897_s16 }
 0x539   : > { %p1063_p8 = pnand %p1066_p7, %p1368_p9 }
 0x53b   : > { %1230 = dma.done.wait (!%p1063_p8), %s898_s7, 16  }
 0x53c   : > { %1232 = vsyncadd (!%p1063_p8), %s898_s7, 4294967280  ;;  %s18_s25 = sadd.s32 1, %s1263_s25   ;;  %s1751_s18 = smov %s1239_s19 }
 0x53d   : > { %p15_p10 = scmp.ge.s32.totalorder %s18_s25, 6   ;;  %s1752_s19 = smov %s1243_s20 }
 0x53e   : > { %s1753_s20 = smov %s1376_s9  ;;  %s1754_s21 = smov %s1255_s23 }
 0x53f   : > { %s1755_s22 = smov %s1259_s24  ;;  %s1756_s23 = smov %s1759_s28 }
 0x540   : > { %s1757_s24 = smov %s1763_s29  ;;  %17 = sbr.rel (!%p15_p10) target bundleno = 5 (0x5), region = 83 }
 0x547   :  { %902 = vsyncpa [#allocation6], 1 }
 0x548   :  { %904 = vsyncpa [#allocation6 + $0x1], 1 }

</bundles_post_ra>
